<compile_context>
chip_gen: v7x
topology: tpu7x:2x2x1
jax: 0.10.0
libtpu: 0.0.40
codegen_flags: <defaults>
</compile_context>

<pallas_src>
import jax
import jax.numpy as jnp
from jax.experimental import pallas as pl
from jax.experimental.pallas import tpu as pltpu

# ---------------------------------------------------------------------------
# Packed bf16 parameter slab layout (128 lanes wide, all offsets multiples of 16
# so every slice is aligned to the bf16 (16,128) native tile):
#   rows   0.. 15 : W1 region  — rows 0..2  = W1 (3,32)  in cols 0..31, rest 0
#   rows  16.. 31 : bias region— row 16 = b1 (cols 0..31), row 17 = b2 (0..15),
#                                row 18 = b3 (cols 0..3), rest 0
#   rows  32..159 : W2 region  — rows 32..63  = W2 (32,16) in cols 0..15, rest 0
#   rows 160..287 : W3 region  — rows 160..175 = W3 (16,4) in cols 0..3,  rest 0
# Zero padding everywhere else keeps the 128-wide intermediates exact.
# ---------------------------------------------------------------------------
W1_OFF, B_OFF, W2_OFF, W3_OFF = 0, 16, 32, 160
SLAB_ROWS = 288


def _mlp_kernel(x_ref, p_ref, o_ref, xa_ref):
    # x_ref : (tile_b, 3)   f32 raw features (no wrapper-side padding pass)
    # p_ref : (288, 128)    bf16 packed [W1 ; biases ; W2 ; W3]
    # o_ref : (tile_b, 4)   f32 logits (exact-size output, no 128-wide slab)
    # xa_ref: (tile_b, 16)  f32 scratch: features zero-padded to a bf16 K-tile
    #
    # Re-zero the scratch every step (cheap: tile_b/8 vreg stores) so lanes 3..15
    # are always 0 — safe under megacore grid splitting where program_id(0)==0
    # never happens on core 1.
    xa_ref[...] = jnp.zeros_like(xa_ref)
    xa_ref[:, 0:3] = x_ref[...]
    x_aug = xa_ref[...].astype(jnp.bfloat16)                    # (tile_b, 16)

    w1 = p_ref[W1_OFF:W1_OFF + 16, :]                           # (16, 128) bf16
    w2 = p_ref[W2_OFF:W2_OFF + 128, :]                          # (128, 128) bf16
    w3 = p_ref[W3_OFF:W3_OFF + 128, :]                          # (128, 128) bf16
    bias = p_ref[B_OFF:B_OFF + 16, :].astype(jnp.float32)       # (16, 128) f32
    b1 = bias[0:1, :]
    b2 = bias[1:2, :]
    b3 = bias[2:3, :]

    h1 = jnp.maximum(
        jnp.dot(x_aug, w1, preferred_element_type=jnp.float32) + b1, 0.0)
    h2 = jnp.maximum(
        jnp.dot(h1.astype(jnp.bfloat16), w2,
                preferred_element_type=jnp.float32) + b2, 0.0)
    logits = jnp.dot(h2.astype(jnp.bfloat16), w3,
                     preferred_element_type=jnp.float32) + b3   # (tile_b, 128)
    o_ref[...] = logits[:, 0:4]


def _round_up(n, m):
    return (n + m - 1) // m * m


def water_classifier_forward(x, slab, *, tile_b=2048):
    """Forward pass. x: (batch, 3) float32, slab: packed bf16 params (288, 128).

    tile_b is a tunable (2048 default fits v5e's 16 MiB default scoped VMEM; up
    to ~4096 is fine on v6e/v7x or on v5e with a raised vmem_limit_bytes).
    """
    b = x.shape[0]
    x = x.astype(jnp.float32)

    # Clamp the tile so the grid has >=2 steps for moderate batches (v7x has two
    # TensorCores; a 1-step "parallel" grid leaves one idle). Keep multiple of 8.
    tile_b = max(8, min(tile_b, _round_up(-(-b // 2), 8)))
    b_pad = _round_up(b, tile_b)
    if b_pad != b:
        x = jnp.pad(x, ((0, b_pad - b), (0, 0)))

    grid = (b_pad // tile_b,)
    flops = 2 * b_pad * (16 * 128 + 128 * 128 + 128 * 128)
    bytes_accessed = b_pad * 3 * 4 + SLAB_ROWS * 128 * 2 + b_pad * 4 * 4

    out = pl.pallas_call(
        _mlp_kernel,
        out_shape=jax.ShapeDtypeStruct((b_pad, 4), jnp.float32),
        grid=grid,
        in_specs=[
            # batch-tiled raw features; last dim (3) == full array dim -> legal
            pl.BlockSpec((tile_b, 3), lambda i: (i, 0)),
            # packed params: constant block index -> one DMA, stays VMEM-resident
            pl.BlockSpec((SLAB_ROWS, 128), lambda i: (0, 0)),
        ],
        # exact-size output block; last dim (4) == full array dim -> legal
        out_specs=pl.BlockSpec((tile_b, 4), lambda i: (i, 0)),
        scratch_shapes=[pltpu.VMEM((tile_b, 16), jnp.float32)],
        compiler_params=pltpu.CompilerParams(
            dimension_semantics=("parallel",),  # megacore split on v7x
        ),
        cost_estimate=pl.CostEstimate(
            flops=flops, transcendentals=0, bytes_accessed=bytes_accessed),
    )(x, slab)

    return out[:b] if b_pad != b else out


def init_params(key):
    """PyTorch nn.Linear default init: U[-1/sqrt(fan_in), +1/sqrt(fan_in)].

    Weights stored as (in_features, out_features) so y = x @ W + b; biases 1-D.
    """
    dims = [(3, 32), (32, 16), (16, 4)]
    params = []
    keys = jax.random.split(key, 2 * len(dims))
    for i, (fan_in, fan_out) in enumerate(dims):
        bound = 1.0 / jnp.sqrt(jnp.float32(fan_in))
        w = jax.random.uniform(keys[2 * i], (fan_in, fan_out),
                               minval=-bound, maxval=bound, dtype=jnp.float32)
        b = jax.random.uniform(keys[2 * i + 1], (fan_out,),
                               minval=-bound, maxval=bound, dtype=jnp.float32)
        params += [w, b]
    return tuple(params)


def pack_params(params):
    """Pack (w1,b1,w2,b2,w3,b3) into one bf16 (288,128) slab (single DMA)."""
    w1, b1, w2, b2, w3, b3 = params
    slab = jnp.zeros((SLAB_ROWS, 128), jnp.float32)
    slab = slab.at[W1_OFF:W1_OFF + 3, 0:32].set(w1)
    slab = slab.at[B_OFF + 0, 0:32].set(b1.reshape(-1))
    slab = slab.at[B_OFF + 1, 0:16].set(b2.reshape(-1))
    slab = slab.at[B_OFF + 2, 0:4].set(b3.reshape(-1))
    slab = slab.at[W2_OFF:W2_OFF + 32, 0:16].set(w2)
    slab = slab.at[W3_OFF:W3_OFF + 16, 0:4].set(w3)
    return slab.astype(jnp.bfloat16)


def reference_forward(x, params):
    w1, b1, w2, b2, w3, b3 = params
    h = jnp.maximum(x @ w1 + b1, 0.0)
    h = jnp.maximum(h @ w2 + b2, 0.0)
    return h @ w3 + b3


if __name__ == "__main__":
    key = jax.random.PRNGKey(0)
    k_params, k_x = jax.random.split(key)

    params = init_params(k_params)
    slab = pack_params(params)

    # x: [batch, 3] water-quality features. batch=20 exercises the tile clamp
    # (tile_b -> 16, 2 grid steps), padding, and the exact-size output path.
    batch = 20
    x = jax.random.normal(k_x, (batch, 3), dtype=jnp.float32)

    fwd = jax.jit(lambda xx, ss: water_classifier_forward(xx, ss))
    out = jax.block_until_ready(fwd(x, slab))

    ref = reference_forward(x, params)
    assert out.shape == (batch, 4), out.shape
    # bf16 matmul operands (f32 accumulation) -> loosened tolerance vs f32 ref.
    assert jnp.allclose(out, ref, atol=5e-2, rtol=1e-2), \
        "mismatch vs pure-JAX reference"

    print("KERNEL_OK")
</pallas_src>

<mosaic_0001>
module attributes {stable_mosaic.version = 11 : i64} {
  func.func @_mlp_kernel(%arg0: i32, %arg1: memref<16x3xf32, #tpu.memory_space<vmem>>, %arg2: memref<288x128xbf16, #tpu.memory_space<vmem>>, %arg3: memref<16x4xf32, #tpu.memory_space<vmem>>, %arg4: memref<16x16xf32, #tpu.memory_space<vmem>>) attributes {dimension_semantics = [#tpu.dimension_semantics<parallel>], iteration_bounds = array<i64: 2>, scalar_prefetch = 0 : i64, scratch_operands = 1 : i64, tpu.core_type = #tpu.core_type<tc>, window_params = [{transform_indices = @transform_0, window_bounds = array<i64: 16, 3>}, {pipeline_mode = #tpu.pipeline_mode<synchronous>, transform_indices = @transform_1, window_bounds = array<i64: 288, 128>}, {transform_indices = @transform_2, window_bounds = array<i64: 16, 4>}]} {
    %cst = arith.constant 0.000000e+00 : f32
    %0 = vector.broadcast %cst : f32 to vector<16x16xf32>
    %c0 = arith.constant 0 : index
    %c0_0 = arith.constant 0 : index
    %1 = vector.load %arg4[%c0, %c0_0] : memref<16x16xf32, #tpu.memory_space<vmem>>, vector<16x16xf32>
    tpu.vector_store %arg4[%c0, %c0_0], %0 {strides = array<i32>} : memref<16x16xf32, #tpu.memory_space<vmem>>, vector<16x16xf32>,
    %c0_1 = arith.constant 0 : index
    %c0_2 = arith.constant 0 : index
    %2 = vector.load %arg1[%c0_1, %c0_2] : memref<16x3xf32, #tpu.memory_space<vmem>>, vector<16x3xf32>
    %c0_3 = arith.constant 0 : index
    %c0_4 = arith.constant 0 : index
    %3 = vector.load %arg4[%c0_3, %c0_4] : memref<16x16xf32, #tpu.memory_space<vmem>>, vector<16x3xf32>
    tpu.vector_store %arg4[%c0_3, %c0_4], %2 {strides = array<i32>} : memref<16x16xf32, #tpu.memory_space<vmem>>, vector<16x3xf32>,
    %c0_5 = arith.constant 0 : index
    %c0_6 = arith.constant 0 : index
    %4 = vector.load %arg4[%c0_5, %c0_6] : memref<16x16xf32, #tpu.memory_space<vmem>>, vector<16x16xf32>
    %5 = arith.truncf %4 : vector<16x16xf32> to vector<16x16xbf16>
    %c0_7 = arith.constant 0 : index
    %c0_8 = arith.constant 0 : index
    %6 = vector.load %arg2[%c0_7, %c0_8] : memref<288x128xbf16, #tpu.memory_space<vmem>>, vector<16x128xbf16>
    %c32 = arith.constant 32 : index
    %c0_9 = arith.constant 0 : index
    %7 = vector.load %arg2[%c32, %c0_9] : memref<288x128xbf16, #tpu.memory_space<vmem>>, vector<128x128xbf16>
    %c160 = arith.constant 160 : index
    %c0_10 = arith.constant 0 : index
    %8 = vector.load %arg2[%c160, %c0_10] : memref<288x128xbf16, #tpu.memory_space<vmem>>, vector<128x128xbf16>
    %c16 = arith.constant 16 : index
    %c0_11 = arith.constant 0 : index
    %9 = vector.load %arg2[%c16, %c0_11] : memref<288x128xbf16, #tpu.memory_space<vmem>>, vector<16x128xbf16>
    %10 = arith.extf %9 : vector<16x128xbf16> to vector<16x128xf32>
    %11 = vector.extract_strided_slice %10 {offsets = [0, 0], sizes = [1, 128], strides = [1, 1]} : vector<16x128xf32> to vector<1x128xf32>
    %12 = vector.extract_strided_slice %10 {offsets = [1, 0], sizes = [1, 128], strides = [1, 1]} : vector<16x128xf32> to vector<1x128xf32>
    %13 = vector.extract_strided_slice %10 {offsets = [2, 0], sizes = [1, 128], strides = [1, 1]} : vector<16x128xf32> to vector<1x128xf32>
    %cst_12 = arith.constant dense<0.000000e+00> : vector<16x128xf32>
    %14 = tpu.matmul %5, %6, %cst_12 {dimension_numbers = #tpu.dot_dimension_numbers<[1], [0], [0], [1], [0, 0, 1, 1], [], []>} : vector<16x16xbf16>, vector<16x128xbf16>, vector<16x128xf32> -> vector<16x128xf32>
    %15 = vector.broadcast %11 : vector<1x128xf32> to vector<16x128xf32>
    %16 = arith.addf %14, %15 : vector<16x128xf32>
    %cst_13 = arith.constant 0.000000e+00 : f32
    %17 = vector.broadcast %cst_13 : f32 to vector<16x128xf32>
    %18 = arith.maximumf %16, %17 : vector<16x128xf32>
    %19 = arith.truncf %18 : vector<16x128xf32> to vector<16x128xbf16>
    %cst_14 = arith.constant dense<0.000000e+00> : vector<16x128xf32>
    %20 = tpu.matmul %19, %7, %cst_14 {dimension_numbers = #tpu.dot_dimension_numbers<[1], [0], [0], [1], [0, 0, 1, 1], [], []>} : vector<16x128xbf16>, vector<128x128xbf16>, vector<16x128xf32> -> vector<16x128xf32>
    %21 = vector.broadcast %12 : vector<1x128xf32> to vector<16x128xf32>
    %22 = arith.addf %20, %21 : vector<16x128xf32>
    %cst_15 = arith.constant 0.000000e+00 : f32
    %23 = vector.broadcast %cst_15 : f32 to vector<16x128xf32>
    %24 = arith.maximumf %22, %23 : vector<16x128xf32>
    %25 = arith.truncf %24 : vector<16x128xf32> to vector<16x128xbf16>
    %cst_16 = arith.constant dense<0.000000e+00> : vector<16x128xf32>
    %26 = tpu.matmul %25, %8, %cst_16 {dimension_numbers = #tpu.dot_dimension_numbers<[1], [0], [0], [1], [0, 0, 1, 1], [], []>} : vector<16x128xbf16>, vector<128x128xbf16>, vector<16x128xf32> -> vector<16x128xf32>
    %27 = vector.broadcast %13 : vector<1x128xf32> to vector<16x128xf32>
    %28 = arith.addf %26, %27 : vector<16x128xf32>
    %29 = vector.extract_strided_slice %28 {offsets = [0, 0], sizes = [16, 4], strides = [1, 1]} : vector<16x128xf32> to vector<16x4xf32>
    %c0_17 = arith.constant 0 : index
    %c0_18 = arith.constant 0 : index
    %30 = vector.load %arg3[%c0_17, %c0_18] : memref<16x4xf32, #tpu.memory_space<vmem>>, vector<16x4xf32>
    tpu.vector_store %arg3[%c0_17, %c0_18], %29 {strides = array<i32>} : memref<16x4xf32, #tpu.memory_space<vmem>>, vector<16x4xf32>,
    return
  }
  func.func @transform_0(%arg0: i32) -> (i32, i32) {
    %c0_i32 = arith.constant 0 : i32
    %c0_i32_0 = arith.constant 0 : i32
    return %arg0, %c0_i32 : i32, i32
  }
  func.func @transform_1(%arg0: i32) -> (i32, i32) {
    %c0_i32 = arith.constant 0 : i32
    %c0_i32_0 = arith.constant 0 : i32
    %c0_i32_1 = arith.constant 0 : i32
    return %c0_i32, %c0_i32_0 : i32, i32
  }
  func.func @transform_2(%arg0: i32) -> (i32, i32) {
    %c0_i32 = arith.constant 0 : i32
    %c0_i32_0 = arith.constant 0 : i32
    return %arg0, %c0_i32 : i32, i32
  }
}

</mosaic_0001>

<bundles_post_ra>
// kernel: _lambda_.1
= control target key start
LH: loop header
LB: loop body
LE: loop exit
PB: predicated region body
PF: predicated region fallthrough
CT: control target
= control target key end

     0   :  { %7 = vsyncpa [#allocation4], 0  ;;  %s724_s9 = smov 0   ;;  %s818_s0 = inlined_call_operand.vmem [shape: f32[32,3], index: 0, kind: input, shape index: {}]   ;;  %s819_s1 = inlined_call_operand.hbm [shape: bf16[288,128], index: 1, kind: input, shape index: {}]   ;;  %s820_s2 = inlined_call_operand.vmem [shape: f32[32,4], index: 2, kind: output, shape index: {}]  }
   0x1 LB: > { %s527_s10 = sadd.s32 4294967295, %s702_s9   ;;  %p529_p0 = scmp.ge.s32.totalorder %s702_s9, 1  ;;  %s702_s9 = sphi %s724_s9, %s13_s9  }
   0x2   : > { %p91_p1 = scmp.lt.s32.totalorder %s702_s9, 3  ;;  %s704_s11 = smov [#allocation3]  }
   0x3   : > { %s103_s12 = sshll.u32 %s704_s11, 4  ;;  %p738_p3 = scmp.eq.s32.totalorder %s527_s10, 0  ;;  %s104_s12 = int_to_ptr.vmem [resolvable:$true] %s103_s12 }
   0x4   : > { %p732_p2 = pnand %p529_p0, %p91_p1  ;;  %s664_s18 = scalar_lea.hbm %s819_s1, 2304 }
   0x5   : > { %s825_s14 = scalar_select %p738_p3, 1, 0 }
   0x6   : > { %s824_s13 = scalar_select %p732_p2, 1, 0 }
   0x7   : > { %p628_p4 = pneg %p732_p2  ;;  %p665_p6 = scmp.ne.s32.totalorder %s819_s1, %s664_s18 }
   0x8   : > { %p671_p10 = scmp.lt.u32.totalorder %s664_s18, %s819_s1 }
   0x9   : > { %p746_p5 = pnand %p738_p3, %p628_p4 }
   0xb   : > { %p666_p7 = pneg %p746_p5 }
   0xd   : > { %p667_p8 = pnand %p666_p7, %p665_p6 }
   0xf   : > { %p668_p9 = pneg %p667_p8 }
  0x11   : > { %p673_p11 = pnand %p671_p10, %p668_p9 }
  0x13   : > { %676 = shalt.err (!%p673_p11)
}
  0x14   : > { %s677_s23 = scalar_lea.vmem %s104_s12, 2304  ;;  %p685_p1 = scmp.lt.s32.totalorder %s104_s12, %s104_s12 }
  0x15   : > { %p678_p12 = scmp.ne.s32.totalorder %s104_s12, %s677_s23  ;;  %p686_p4 = scmp.lt.s32.totalorder %s677_s23, %s677_s23 }
  0x17   : > { %p680_p13 = pnand %p678_p12, %p666_p7  ;;  %p687_p3 = por %p686_p4, %p685_p1 }
  0x19   : > { %p681_p0 = pneg %p680_p13 }
  0x1b   : > { %p688_p2 = pnand %p687_p3, %p681_p0 }
  0x1d   : > { %691 = shalt.err (!%p688_p2)
}
  0x1e   : > { %s705_s24 = smov 64   ;;  %s706_s25 = smov 4  }
  0x1f   : > { %631 = dma.hbm_to_vmem [thread:$0]  (!%p746_p5), %s819_s1, 2304, %s104_s12, [#allocation4], %s705_s24, %s705_s24, %s706_s25  }
  0x20   : > { %p827_p6 = scmp.ne.s32.totalorder %s824_s13, 0 }
  0x21   : > { %p828_p8 = scmp.ne.s32.totalorder (!%p827_p6), %s825_s14, 0 }
  0x22   : > { %128 = sbr.rel (%p827_p6) target bundleno = 716 (0x2cc), region = 28 }
  0x29   : > { %697 = dma.done.wait (%p828_p8), [#allocation4], 2304  }
  0x2a   : > { %699 = vsyncadd (%p828_p8), [#allocation4], 4294964992  ;;  %s534_s28 = sshll.u32 %s527_s10, 1  ;;  %vm163_vm0 = vcmask 130048   ;;  %v707_v0 = vmov 0.0   ;;  %vm708_vm1 = vmmov 0   ;;  %v210_v21 = vlaneseq }
  0x2b   : > { %578 = vmatprep.subr.bf16.mxu0 %v707_v0  ;;  %580 = vmatprep.mubr.msk.bf16.mxu0 %vm708_vm1, %v707_v0  ;;  %p151_p2 = scmp.lt.s32.totalorder %s534_s28, 3  ;;  %164 = vst.msk [vmem:[#allocation2] sm:$0xff] %vm163_vm0, %v707_v0  ;;  %165 = vst.msk [vmem:[#allocation2 + $0x8] sm:$0xff] %vm163_vm0, %v707_v0  ;;  %vm168_vm2 = vcmask 23552   ;;  %v647_v1 = vld [vmem:[#allocation3] sm:$0xff]   ;;  %v648_v4 = vld [vmem:[#allocation3 + $0x10] sm:$0xff]  }
  0x2c   : > { %584 = vmatprep.subr.bf16.mxu1 %v707_v0  ;;  %600 = vmatprep.mubr.msk.bf16.mxu1 %vm708_vm1, %v707_v0  ;;  %v649_v5 = vld [vmem:[#allocation3 + $0x18] sm:$0xff]   ;;  %v650_v6 = vld [vmem:[#allocation3 + $0x20] sm:$0xff]   ;;  %v651_v10 = vld [vmem:[#allocation3 + $0x28] sm:$0xff]   ;;  %v211_v22 = vshrl.u32 %v210_v21, 7  ;;  %vm456_vm3 = vcmask 31744  }
  0x2d   : > { %s830_s28 = smov (!%p151_p2, %s534_s28), 3  ;;  %579 = vmatpush3.bf16.msra.mxu0 %v647_v1  ;;  %585 = vmatpush3.bf16.msra.mxu1 %v648_v4  ;;  %v652_v11 = vld [vmem:[#allocation3 + $0x30] sm:$0xff]   ;;  %v653_v12 = vld [vmem:[#allocation3 + $0x38] sm:$0xff]   ;;  %v654_v13 = vld [vmem:[#allocation3 + $0x40] sm:$0xff]  }
  0x2e   : > { %s535_s29 = sshll.u32 %s830_s28, 3  ;;  %604 = vmatprep.subr.bf16.mxu0 %v707_v0  ;;  %586 = vmatprep.subr.bf16.mxu1 %v707_v0  ;;  %v655_v14 = vld [vmem:[#allocation3 + $0x48] sm:$0xff]   ;;  %v656_v15 = vld [vmem:[#allocation3 + $0x50] sm:$0xff]   ;;  %v657_v16 = vld [vmem:[#allocation3 + $0x58] sm:$0xff]   ;;  %v212_v25 = vsub.s32 0, %v211_v22  ;;  %v269_v38 = vsub.s32 1, %v211_v22 }
  0x2f   : > { %s154_s4 = scalar_lea.vmem %s818_s0, %s535_s29  ;;  %v658_v17 = vld [vmem:[#allocation3 + $0x60] sm:$0xff]   ;;  %v659_v18 = vld [vmem:[#allocation3 + $0x68] sm:$0xff]   ;;  %v660_v19 = vld [vmem:[#allocation3 + $0x70] sm:$0xff]   ;;  %v365_v49 = vsub.s32 2, %v211_v22  ;;  %s160_s7 = scalar_lea.vmem %s820_s2, %s535_s29 }
  0x30   : > { %v166_v2 = vld [vmem:[%s154_s4] sm:$0xff]  ;;  %v167_v3 = vld [vmem:[%s154_s4 + $0x8] sm:$0xff]  ;;  %v208_v23 = vld [vmem:[#allocation3 + $0x8] sm:$0xf] }
  0x31   : > { %169 = vst.msk [vmem:[#allocation2] sm:$0xff] %vm168_vm2, %v166_v2  ;;  %170 = vst.msk [vmem:[#allocation2 + $0x8] sm:$0xff] %vm168_vm2, %v167_v3  ;;  %587 = vmatpush3.bf16.msra.mxu1 %v649_v5  ;;  %v661_v20 = vld [vmem:[#allocation3 + $0x78] sm:$0xff]   ;;  %v209_v24 = vunpack.c.l.bf16 %v208_v23  ;;  %v662_v36 = vld [vmem:[#allocation3 + $0x80] sm:$0xff]  }
  0x32   : > { %588 = vmatprep.subr.bf16.mxu1 %v707_v0  ;;  %v663_v37 = vld [vmem:[#allocation3 + $0x88] sm:$0xff]  }
  0x33   : > { %v213_v26 = vrot.slane %v209_v24, %v212_v25  ;;  %v270_v39 = vrot.slane %v209_v24, %v269_v38  ;;  %v366_v50 = vrot.slane %v209_v24, %v365_v49 }
  0x35   : > { %589 = vmatpush3.bf16.msra.mxu1 %v650_v6 }
  0x36   : > { %590 = vmatprep.subr.bf16.mxu1 %v707_v0 }
  0x38   : > { %v171_v7 = vld [vmem:[#allocation2] sm:$0xff]  ;;  %v172_v8 = vld [vmem:[#allocation2 + $0x8] sm:$0xff] }
  0x39   : > { %v173_v9 = vpack.c.bf16 %v172_v8, %v171_v7  ;;  %591 = vmatpush3.bf16.msra.mxu1 %v651_v10 }
  0x3a   : > { %592 = vmatprep.subr.bf16.mxu1 %v707_v0 }
  0x3b   : > { %581 = vmatmul.mubr.msk.bf16.vlgmr.msra.gmra.mrb[0].mxu0 %vm163_vm0, %v173_v9 }
  0x3c   : > { %620 = vmatprep.mubr.msk.bf16.mxu0 %vm708_vm1, %v707_v0  ;;  %605 = vmatpush3.bf16.msra.mxu0 %v656_v15 }
  0x3d   : > { %593 = vmatpush3.bf16.msra.mxu1 %v652_v11  ;;  %606 = vmatprep.subr.bf16.mxu0 %v707_v0 }
  0x3e   : > { %594 = vmatprep.subr.bf16.mxu1 %v707_v0 }
  0x40   : > { %607 = vmatpush3.bf16.msra.mxu0 %v657_v16 }
  0x41   : > { %595 = vmatpush3.bf16.msra.mxu1 %v653_v12  ;;  %608 = vmatprep.subr.bf16.mxu0 %v707_v0 }
  0x42   : > { %596 = vmatprep.subr.bf16.mxu1 %v707_v0 }
  0x44   : > { %609 = vmatpush3.bf16.msra.mxu0 %v658_v17 }
  0x45   : > { %597 = vmatpush3.bf16.msra.mxu1 %v654_v13  ;;  %610 = vmatprep.subr.bf16.mxu0 %v707_v0 }
  0x46   : > { %598 = vmatprep.subr.bf16.mxu1 %v707_v0 }
  0x48   : > { %611 = vmatpush3.bf16.msra.mxu0 %v659_v18 }
  0x49   : > { %599 = vmatpush3.bf16.msra.mxu1 %v655_v14  ;;  %612 = vmatprep.subr.bf16.mxu0 %v707_v0 }
  0x4c   : > { %613 = vmatpush3.bf16.msra.mxu0 %v660_v19 }
  0x4d   : > { %614 = vmatprep.subr.bf16.mxu0 %v707_v0 }
  0x50   : > { %615 = vmatpush3.bf16.msra.mxu0 %v661_v20 }
  0x51   : > { %616 = vmatprep.subr.bf16.mxu0 %v707_v0 }
  0x54   : > { %617 = vmatpush3.bf16.msra.mxu0 %v662_v36 }
  0x55   : > { %618 = vmatprep.subr.bf16.mxu0 %v707_v0 }
  0x58   : > { %619 = vmatpush3.bf16.msra.mxu0 %v663_v37 }
 0x10e   : > { %v257_v27 = vpop.f32.mrb[0].mxu0 }
 0x10f   : > { %v258_v28 = vadd.f32 %v257_v27, %v213_v26  ;;  %v582_v29 = vpop.f32.mrb[1].mxu0 }
 0x110   : > { %v260_v30 = vpop.f32.mrb[2].mxu0 }
 0x111   : > { %v261_v31 = vadd.f32 %v260_v30, %v213_v26  ;;  %v583_v32 = vpop.f32.mrb[3].mxu0  ;;  %v264_v33 = vmax.f32 %v258_v28, 0.0 }
 0x113   : > { %v265_v34 = vmax.f32 %v261_v31, 0.0 }
 0x115   : > { %v266_v35 = vpack.c.bf16 %v265_v34, %v264_v33 }
 0x117   : > { %601 = vmatmul.mubr.bf16.vlgmr.msra.gmra.mrb[0].mxu1 %v266_v35 }
 0x1ea   : > { %v353_v40 = vpop.f32.mrb[0].mxu1 }
 0x1eb   : > { %v354_v41 = vadd.f32 %v353_v40, %v270_v39  ;;  %v602_v42 = vpop.f32.mrb[1].mxu1 }
 0x1ec   : > { %v356_v43 = vpop.f32.mrb[2].mxu1 }
 0x1ed   : > { %v357_v44 = vadd.f32 %v356_v43, %v270_v39  ;;  %v603_v45 = vpop.f32.mrb[3].mxu1  ;;  %v360_v46 = vmax.f32 %v354_v41, 0.0 }
 0x1ef   : > { %v361_v47 = vmax.f32 %v357_v44, 0.0 }
 0x1f1   : > { %v362_v48 = vpack.c.bf16 %v361_v47, %v360_v46 }
 0x1f3   : > { %621 = vmatmul.mubr.bf16.vlgmr.msra.gmra.mrb[4].mxu0 %v362_v48 }
 0x2c6   : > { %v449_v51 = vpop.f32.mrb[4].mxu0 }
 0x2c7   : > { %v450_v52 = vadd.f32 %v449_v51, %v366_v50  ;;  %v622_v53 = vpop.f32.mrb[5].mxu0 }
 0x2c8   : > { %v452_v54 = vpop.f32.mrb[6].mxu0 }
 0x2c9   : > { %457 = vst.msk [vmem:[%s160_s7] sm:$0xff] %vm456_vm3, %v450_v52  ;;  %v453_v55 = vadd.f32 %v452_v54, %v366_v50  ;;  %v623_v56 = vpop.f32.mrb[7].mxu0 }
 0x2cb   : > { %458 = vst.msk [vmem:[%s160_s7 + $0x8] sm:$0xff] %vm456_vm3, %v453_v55 }
 0x2cc PF: > { %s13_s9 = sadd.s32 1, %s702_s9  }
 0x2cd   : > { %p10_p3 = scmp.ge.s32.totalorder %s13_s9, 4  }
 0x2cf   :  { %12 = sbr.rel (!%p10_p3) target bundleno = 1 (0x1), region = 63 }
 0x2d6   :  { %481 = vsyncpa [#allocation4], 1 }
 0x2d7   :  { %483 = vsyncpa [#allocation4 + $0x1], 1 }

</bundles_post_ra>
